<compile_context>
chip_gen: v5e
topology: v5e:2x2
jax: 0.10.0
libtpu: 0.0.40
codegen_flags: <defaults>
</compile_context>

<pallas_src>
import math

import jax
import jax.numpy as jnp
from jax.experimental import pallas as pl
from jax.experimental.pallas import tpu as pltpu

# ---- model hyperparameters (small, consistent with the module; H must divide E) ----
E = 32        # embedding_dim
H = 4         # num_heads (module default 10 does not divide default E=4 -> valid pair)
HD = E // H   # head dim
MLP = 128     # mlp_size
S = 8         # sequence length
B = 2         # batch
EPS = 1e-5    # nn.LayerNorm default eps
_SQRT2 = math.sqrt(2.0)

assert E % H == 0
assert MLP <= 128 and E <= 128 and 3 * E <= 128  # packed-param rows are 128 lanes wide

# Packed small-parameter tile: one (8, 128) f32 vreg.
# row 0: ln1 gamma | row 1: ln1 beta | row 2: ln2 gamma | row 3: ln2 beta
# row 4: attn out-proj bias | row 5: mlp fc1 bias | row 6: mlp fc2 bias | row 7: unused
_R_LN1G, _R_LN1B, _R_LN2G, _R_LN2B, _R_BOUT, _R_B1, _R_B2 = range(7)


def encoder_block_kernel(
    x_ref,        # (Bt, S, E)     activations for this grid step
    vec_ref,      # (8, 128)       packed LN params + biases (see above)
    w_qkv_ref,    # (G, E, 3*HD)   per-(batch,head) in-proj weights, G = Bt*H
    b_qkv_ref,    # (G, 1, 3*HD)   per-(batch,head) in-proj biases
    w_out_ref,    # (G, HD, E)     per-head slices of out-proj weight
    w1_ref,       # (E, MLP)       mlp fc1 weight (transposed)
    w2_ref,       # (MLP, E)       mlp fc2 weight (transposed)
    o_ref,        # (Bt, S, E)
):
    Bt = x_ref.shape[0]
    G = Bt * H
    N = Bt * S

    # TODO(synk): dropout (attn_dropout / mlp_dropout) is identity (inference mode).

    x = x_ref[...].astype(jnp.float32).reshape(N, E)          # (N, E) row slab

    # ---------------- MSA block ----------------
    # LayerNorm 1
    mu = jnp.mean(x, axis=-1, keepdims=True)
    var = jnp.mean((x - mu) ** 2, axis=-1, keepdims=True)
    y = (x - mu) * jax.lax.rsqrt(var + EPS)
    y = y * vec_ref[_R_LN1G:_R_LN1G + 1, :E] + vec_ref[_R_LN1B:_R_LN1B + 1, :E]

    # Replicate rows per head: (Bt, S, E) -> (Bt, H, S, E) -> (G, S, E).
    # (leading-dim broadcast + merge only; minor dims untouched)
    y_rep = jnp.broadcast_to(y.reshape(Bt, 1, S, E), (Bt, H, S, E)).reshape(G, S, E)

    # Head-batched qkv projection: one batched contraction, no per-head loop.
    qkv = jnp.einsum('gse,gef->gsf', y_rep, w_qkv_ref[...],
                     preferred_element_type=jnp.float32) + b_qkv_ref[...]   # (G, S, 3*HD)
    q = qkv[..., 0 * HD:1 * HD]
    k = qkv[..., 1 * HD:2 * HD]
    v = qkv[..., 2 * HD:3 * HD]

    scale = 1.0 / math.sqrt(HD)
    s = jnp.einsum('gqd,gkd->gqk', q, k,
                   preferred_element_type=jnp.float32) * scale              # (G, S, S)
    s = s - jnp.max(s, axis=-1, keepdims=True)
    p = jnp.exp(s)
    p = p * pl.reciprocal(jnp.sum(p, axis=-1, keepdims=True), approx=True)
    o = jnp.einsum('gqk,gkd->gqd', p, v,
                   preferred_element_type=jnp.float32)                      # (G, S, HD)

    # Out-proj with the head merge folded in: per-head partial products, then
    # sum over heads (no concatenate).
    part = jnp.einsum('gsd,gde->gse', o, w_out_ref[...],
                      preferred_element_type=jnp.float32)                   # (G, S, E)
    attn = jnp.sum(part.reshape(Bt, H, S, E), axis=1).reshape(N, E)
    attn = attn + vec_ref[_R_BOUT:_R_BOUT + 1, :E]

    # residual 1
    x1 = attn + x                                                           # (N, E)

    # ---------------- MLP block ----------------
    # LayerNorm 2
    mu2 = jnp.mean(x1, axis=-1, keepdims=True)
    var2 = jnp.mean((x1 - mu2) ** 2, axis=-1, keepdims=True)
    y2 = (x1 - mu2) * jax.lax.rsqrt(var2 + EPS)
    y2 = y2 * vec_ref[_R_LN2G:_R_LN2G + 1, :E] + vec_ref[_R_LN2B:_R_LN2B + 1, :E]

    # Linear -> exact GELU (erf) -> Linear
    h1 = jnp.dot(y2, w1_ref[...], preferred_element_type=jnp.float32)
    h1 = h1 + vec_ref[_R_B1:_R_B1 + 1, :MLP]
    g = 0.5 * h1 * (1.0 + jax.lax.erf(h1 / _SQRT2))
    mlp_out = jnp.dot(g, w2_ref[...], preferred_element_type=jnp.float32)
    mlp_out = mlp_out + vec_ref[_R_B2:_R_B2 + 1, :E]

    # residual 2
    out = mlp_out + x1
    o_ref[...] = out.reshape(Bt, S, E).astype(o_ref.dtype)


def _pad_row(v):
    v = v.reshape(-1).astype(jnp.float32)
    return jnp.pad(v, (0, 128 - v.shape[0]))


def _prep_params(params, bt):
    """Repack PyTorch-layout parameters for the kernel (done once per call)."""
    # One (8, 128) tile holding all the tiny 1-row parameters -> one DMA.
    vec = jnp.stack([
        _pad_row(params["ln1_g"]), _pad_row(params["ln1_b"]),
        _pad_row(params["ln2_g"]), _pad_row(params["ln2_b"]),
        _pad_row(params["b_out"]), _pad_row(params["b1"]),
        _pad_row(params["b2"]), jnp.zeros((128,), jnp.float32),
    ])                                                                      # (8, 128)

    # in-proj weight (E, 3E) -> per-head (H, E, 3*HD), columns = [q_h | k_h | v_h]
    w_qkv_h = (params["w_in"].reshape(E, 3, H, HD)
               .transpose(2, 0, 1, 3).reshape(H, E, 3 * HD))
    w_qkv = jnp.tile(w_qkv_h, (bt, 1, 1))                                   # (G, E, 3*HD)

    b_qkv_h = (params["b_in"].reshape(3, H, HD)
               .transpose(1, 0, 2).reshape(H, 3 * HD))
    b_qkv = jnp.tile(b_qkv_h, (bt, 1))[:, None, :]                          # (G, 1, 3*HD)

    # out-proj weight (E, E) split into per-head row blocks (H, HD, E)
    w_out_h = params["w_out"].reshape(H, HD, E)
    w_out = jnp.tile(w_out_h, (bt, 1, 1))                                   # (G, HD, E)

    return vec, w_qkv, b_qkv, w_out, params["w1"], params["w2"]


def transformer_encoder_block(x, params, *, batch_tiles=1):
    """x: (B, S, E) float32. params: dict of weights (see init_params).

    batch_tiles: number of grid steps the batch is split into.
      * v5e / v6e (single TensorCore): use 1 (default) -> one big slab, no
        per-step overhead.
      * v7x (2 TensorCores): use 2 so each core takes half the batch.
    """
    Bx, Sx, Ex = x.shape
    assert (Sx, Ex) == (S, E)
    assert Bx % batch_tiles == 0
    bt = Bx // batch_tiles
    G = bt * H

    vec, w_qkv, b_qkv, w_out, w1, w2 = _prep_params(params, bt)

    def const_spec(shape):
        return pl.BlockSpec(shape, lambda i, _n=len(shape): (0,) * _n)

    in_specs = [
        pl.BlockSpec((bt, S, E), lambda i: (i, 0, 0)),   # x (per-step batch tile)
        const_spec((8, 128)),                            # packed LN params + biases
        const_spec((G, E, 3 * HD)),                      # per-head in-proj weights
        const_spec((G, 1, 3 * HD)),                      # per-head in-proj biases
        const_spec((G, HD, E)),                          # per-head out-proj weights
        const_spec((E, MLP)),                            # mlp fc1 W^T
        const_spec((MLP, E)),                            # mlp fc2 W^T
    ]

    return pl.pallas_call(
        encoder_block_kernel,
        out_shape=jax.ShapeDtypeStruct((Bx, S, E), x.dtype),
        grid_spec=pltpu.PrefetchScalarGridSpec(
            num_scalar_prefetch=0,
            grid=(batch_tiles,),
            in_specs=in_specs,
            out_specs=pl.BlockSpec((bt, S, E), lambda i: (i, 0, 0)),
        ),
        compiler_params=pltpu.CompilerParams(
            dimension_semantics=("parallel",)),
    )(x, vec, w_qkv, b_qkv, w_out, w1, w2)


def init_params(key):
    ks = jax.random.split(key, 8)
    scale = 0.02
    return {
        # LayerNorm 1 (gamma=1, beta=0 like nn.LayerNorm default init)
        "ln1_g": jnp.ones((E,), jnp.float32),
        "ln1_b": jnp.zeros((E,), jnp.float32),
        # nn.MultiheadAttention in_proj: torch weight (3E, E); stored transposed (E, 3E)
        "w_in": scale * jax.random.normal(ks[0], (E, 3 * E), jnp.float32),
        "b_in": scale * jax.random.normal(ks[1], (3 * E,), jnp.float32),
        # out_proj: torch (E, E); stored transposed (E, E)
        "w_out": scale * jax.random.normal(ks[2], (E, E), jnp.float32),
        "b_out": scale * jax.random.normal(ks[3], (E,), jnp.float32),
        # LayerNorm 2
        "ln2_g": jnp.ones((E,), jnp.float32),
        "ln2_b": jnp.zeros((E,), jnp.float32),
        # MLP linear1 (E -> MLP): torch weight (MLP, E); stored transposed (E, MLP)
        "w1": scale * jax.random.normal(ks[4], (E, MLP), jnp.float32),
        "b1": scale * jax.random.normal(ks[5], (MLP,), jnp.float32),
        # MLP linear2 (MLP -> E): torch weight (E, MLP); stored transposed (MLP, E)
        "w2": scale * jax.random.normal(ks[6], (MLP, E), jnp.float32),
        "b2": scale * jax.random.normal(ks[7], (E,), jnp.float32),
    }


if __name__ == "__main__":
    key = jax.random.PRNGKey(0)
    kx, kp = jax.random.split(key)
    x = jax.random.normal(kx, (B, S, E), jnp.float32)
    params = init_params(kp)

    out = transformer_encoder_block(x, params, batch_tiles=1)
    out = jax.block_until_ready(out)
    assert out.shape == (B, S, E)
    assert bool(jnp.all(jnp.isfinite(out)))
    print("KERNEL_OK")
</pallas_src>

<mosaic_0001>
module attributes {stable_mosaic.version = 11 : i64} {
  func.func @encoder_block_kernel(%arg0: i32, %arg1: memref<2x8x32xf32, #tpu.memory_space<vmem>>, %arg2: memref<8x128xf32, #tpu.memory_space<vmem>>, %arg3: memref<8x32x24xf32, #tpu.memory_space<vmem>>, %arg4: memref<8x1x24xf32, #tpu.memory_space<vmem>>, %arg5: memref<8x8x32xf32, #tpu.memory_space<vmem>>, %arg6: memref<32x128xf32, #tpu.memory_space<vmem>>, %arg7: memref<128x32xf32, #tpu.memory_space<vmem>>, %arg8: memref<2x8x32xf32, #tpu.memory_space<vmem>>) attributes {dimension_semantics = [#tpu.dimension_semantics<parallel>], iteration_bounds = array<i64: 1>, scalar_prefetch = 0 : i64, scratch_operands = 0 : i64, tpu.core_type = #tpu.core_type<tc>, window_params = [{transform_indices = @transform_0, window_bounds = array<i64: 2, 8, 32>}, {pipeline_mode = #tpu.pipeline_mode<synchronous>, transform_indices = @transform_1, window_bounds = array<i64: 8, 128>}, {pipeline_mode = #tpu.pipeline_mode<synchronous>, transform_indices = @transform_2, window_bounds = array<i64: 8, 32, 24>}, {pipeline_mode = #tpu.pipeline_mode<synchronous>, transform_indices = @transform_3, window_bounds = array<i64: 8, 1, 24>}, {pipeline_mode = #tpu.pipeline_mode<synchronous>, transform_indices = @transform_4, window_bounds = array<i64: 8, 8, 32>}, {pipeline_mode = #tpu.pipeline_mode<synchronous>, transform_indices = @transform_5, window_bounds = array<i64: 32, 128>}, {pipeline_mode = #tpu.pipeline_mode<synchronous>, transform_indices = @transform_6, window_bounds = array<i64: 128, 32>}, {transform_indices = @transform_7, window_bounds = array<i64: 2, 8, 32>}]} {
    %c0 = arith.constant 0 : index
    %c0_0 = arith.constant 0 : index
    %c0_1 = arith.constant 0 : index
    %0 = vector.load %arg1[%c0, %c0_0, %c0_1] : memref<2x8x32xf32, #tpu.memory_space<vmem>>, vector<2x8x32xf32>
    %1 = vector.shape_cast %0 : vector<2x8x32xf32> to vector<16x32xf32>
    %cst = arith.constant dense<0.000000e+00> : vector<16xf32>
    %2 = vector.multi_reduction <add>, %1, %cst [1] : vector<16x32xf32> to vector<16xf32>
    %3 = vector.shape_cast %2 : vector<16xf32> to vector<16x1xf32>
    %cst_2 = arith.constant 3.200000e+01 : f32
    %4 = vector.broadcast %cst_2 : f32 to vector<16x1xf32>
    %5 = arith.divf %3, %4 : vector<16x1xf32>
    %6 = vector.broadcast %5 : vector<16x1xf32> to vector<16x32xf32>
    %7 = arith.subf %1, %6 : vector<16x32xf32>
    %8 = arith.mulf %7, %7 : vector<16x32xf32>
    %cst_3 = arith.constant dense<0.000000e+00> : vector<16xf32>
    %9 = vector.multi_reduction <add>, %8, %cst_3 [1] : vector<16x32xf32> to vector<16xf32>
    %10 = vector.shape_cast %9 : vector<16xf32> to vector<16x1xf32>
    %cst_4 = arith.constant 3.200000e+01 : f32
    %11 = vector.broadcast %cst_4 : f32 to vector<16x1xf32>
    %12 = arith.divf %10, %11 : vector<16x1xf32>
    %13 = vector.broadcast %5 : vector<16x1xf32> to vector<16x32xf32>
    %14 = arith.subf %1, %13 : vector<16x32xf32>
    %cst_5 = arith.constant 9.99999974E-6 : f32
    %15 = vector.broadcast %cst_5 : f32 to vector<16x1xf32>
    %16 = arith.addf %12, %15 : vector<16x1xf32>
    %17 = math.rsqrt %16 : vector<16x1xf32>
    %18 = vector.broadcast %17 : vector<16x1xf32> to vector<16x32xf32>
    %19 = arith.mulf %14, %18 : vector<16x32xf32>
    %c0_6 = arith.constant 0 : index
    %c0_7 = arith.constant 0 : index
    %20 = vector.load %arg2[%c0_6, %c0_7] : memref<8x128xf32, #tpu.memory_space<vmem>>, vector<1x32xf32>
    %21 = vector.broadcast %20 : vector<1x32xf32> to vector<16x32xf32>
    %22 = arith.mulf %19, %21 : vector<16x32xf32>
    %c1 = arith.constant 1 : index
    %c0_8 = arith.constant 0 : index
    %23 = vector.load %arg2[%c1, %c0_8] : memref<8x128xf32, #tpu.memory_space<vmem>>, vector<1x32xf32>
    %24 = vector.broadcast %23 : vector<1x32xf32> to vector<16x32xf32>
    %25 = arith.addf %22, %24 : vector<16x32xf32>
    %26 = vector.shape_cast %25 : vector<16x32xf32> to vector<2x1x8x32xf32>
    %27 = vector.shape_cast %26 : vector<2x1x8x32xf32> to vector<2x1x8x32xf32>
    %28 = vector.broadcast %27 : vector<2x1x8x32xf32> to vector<2x4x8x32xf32>
    %29 = vector.shape_cast %28 : vector<2x4x8x32xf32> to vector<8x8x32xf32>
    %c0_9 = arith.constant 0 : index
    %c0_10 = arith.constant 0 : index
    %c0_11 = arith.constant 0 : index
    %30 = vector.load %arg3[%c0_9, %c0_10, %c0_11] : memref<8x32x24xf32, #tpu.memory_space<vmem>>, vector<8x32x24xf32>
    "tpu.trace_start"() <{level = 10 : i32, message = "gse,gef->gsf"}> : () -> ()
    %cst_12 = arith.constant dense<0.000000e+00> : vector<8x8x24xf32>
    %31 = tpu.matmul %29, %30, %cst_12 {dimension_numbers = #tpu.dot_dimension_numbers<[2], [1], [1], [2], [0, 0, 0, 1, 1, 2], [0], [0]>} : vector<8x8x32xf32>, vector<8x32x24xf32>, vector<8x8x24xf32> -> vector<8x8x24xf32>
    "tpu.trace_stop"() : () -> ()
    %c0_13 = arith.constant 0 : index
    %c0_14 = arith.constant 0 : index
    %c0_15 = arith.constant 0 : index
    %32 = vector.load %arg4[%c0_13, %c0_14, %c0_15] : memref<8x1x24xf32, #tpu.memory_space<vmem>>, vector<8x1x24xf32>
    %33 = vector.broadcast %32 : vector<8x1x24xf32> to vector<8x8x24xf32>
    %34 = arith.addf %31, %33 : vector<8x8x24xf32>
    %35 = vector.extract_strided_slice %34 {offsets = [0, 0, 0], sizes = [8, 8, 8], strides = [1, 1, 1]} : vector<8x8x24xf32> to vector<8x8x8xf32>
    %36 = vector.extract_strided_slice %34 {offsets = [0, 0, 8], sizes = [8, 8, 8], strides = [1, 1, 1]} : vector<8x8x24xf32> to vector<8x8x8xf32>
    %37 = vector.extract_strided_slice %34 {offsets = [0, 0, 16], sizes = [8, 8, 8], strides = [1, 1, 1]} : vector<8x8x24xf32> to vector<8x8x8xf32>
    "tpu.trace_start"() <{level = 10 : i32, message = "gqd,gkd->gqk"}> : () -> ()
    %cst_16 = arith.constant dense<0.000000e+00> : vector<8x8x8xf32>
    %38 = tpu.matmul %35, %36, %cst_16 {dimension_numbers = #tpu.dot_dimension_numbers<[2], [2], [1], [1], [0, 0, 0, 1, 1, 1], [0], [0]>} : vector<8x8x8xf32>, vector<8x8x8xf32>, vector<8x8x8xf32> -> vector<8x8x8xf32>
    "tpu.trace_stop"() : () -> ()
    %cst_17 = arith.constant 0.353553385 : f32
    %39 = vector.broadcast %cst_17 : f32 to vector<8x8x8xf32>
    %40 = arith.mulf %38, %39 : vector<8x8x8xf32>
    %cst_18 = arith.constant dense<0xFF800000> : vector<8x8xf32>
    %41 = vector.multi_reduction <maximumf>, %40, %cst_18 [2] : vector<8x8x8xf32> to vector<8x8xf32>
    %42 = vector.shape_cast %41 : vector<8x8xf32> to vector<8x8x1xf32>
    %43 = vector.broadcast %42 : vector<8x8x1xf32> to vector<8x8x8xf32>
    %44 = arith.subf %40, %43 : vector<8x8x8xf32>
    %45 = math.exp %44 : vector<8x8x8xf32>
    %cst_19 = arith.constant dense<0.000000e+00> : vector<8x8xf32>
    %46 = vector.multi_reduction <add>, %45, %cst_19 [2] : vector<8x8x8xf32> to vector<8x8xf32>
    %47 = vector.shape_cast %46 : vector<8x8xf32> to vector<8x8x1xf32>
    %48 = tpu.reciprocal %47 {approx = true} : vector<8x8x1xf32> -> vector<8x8x1xf32>
    %49 = vector.broadcast %48 : vector<8x8x1xf32> to vector<8x8x8xf32>
    %50 = arith.mulf %45, %49 : vector<8x8x8xf32>
    "tpu.trace_start"() <{level = 10 : i32, message = "gqk,gkd->gqd"}> : () -> ()
    %cst_20 = arith.constant dense<0.000000e+00> : vector<8x8x8xf32>
    %51 = tpu.matmul %50, %37, %cst_20 {dimension_numbers = #tpu.dot_dimension_numbers<[2], [1], [1], [2], [0, 0, 0, 1, 1, 2], [0], [0]>} : vector<8x8x8xf32>, vector<8x8x8xf32>, vector<8x8x8xf32> -> vector<8x8x8xf32>
    "tpu.trace_stop"() : () -> ()
    %c0_21 = arith.constant 0 : index
    %c0_22 = arith.constant 0 : index
    %c0_23 = arith.constant 0 : index
    %52 = vector.load %arg5[%c0_21, %c0_22, %c0_23] : memref<8x8x32xf32, #tpu.memory_space<vmem>>, vector<8x8x32xf32>
    "tpu.trace_start"() <{level = 10 : i32, message = "gsd,gde->gse"}> : () -> ()
    %cst_24 = arith.constant dense<0.000000e+00> : vector<8x8x32xf32>
    %53 = tpu.matmul %51, %52, %cst_24 {dimension_numbers = #tpu.dot_dimension_numbers<[2], [1], [1], [2], [0, 0, 0, 1, 1, 2], [0], [0]>} : vector<8x8x8xf32>, vector<8x8x32xf32>, vector<8x8x32xf32> -> vector<8x8x32xf32>
    "tpu.trace_stop"() : () -> ()
    %54 = vector.shape_cast %53 : vector<8x8x32xf32> to vector<2x4x8x32xf32>
    %cst_25 = arith.constant dense<0.000000e+00> : vector<2x8x32xf32>
    %55 = vector.multi_reduction <add>, %54, %cst_25 [1] : vector<2x4x8x32xf32> to vector<2x8x32xf32>
    %56 = vector.shape_cast %55 : vector<2x8x32xf32> to vector<16x32xf32>
    %c4 = arith.constant 4 : index
    %c0_26 = arith.constant 0 : index
    %57 = vector.load %arg2[%c4, %c0_26] : memref<8x128xf32, #tpu.memory_space<vmem>>, vector<1x32xf32>
    %58 = vector.broadcast %57 : vector<1x32xf32> to vector<16x32xf32>
    %59 = arith.addf %56, %58 : vector<16x32xf32>
    %60 = arith.addf %59, %1 : vector<16x32xf32>
    %cst_27 = arith.constant dense<0.000000e+00> : vector<16xf32>
    %61 = vector.multi_reduction <add>, %60, %cst_27 [1] : vector<16x32xf32> to vector<16xf32>
    %62 = vector.shape_cast %61 : vector<16xf32> to vector<16x1xf32>
    %cst_28 = arith.constant 3.200000e+01 : f32
    %63 = vector.broadcast %cst_28 : f32 to vector<16x1xf32>
    %64 = arith.divf %62, %63 : vector<16x1xf32>
    %65 = vector.broadcast %64 : vector<16x1xf32> to vector<16x32xf32>
    %66 = arith.subf %60, %65 : vector<16x32xf32>
    %67 = arith.mulf %66, %66 : vector<16x32xf32>
    %cst_29 = arith.constant dense<0.000000e+00> : vector<16xf32>
    %68 = vector.multi_reduction <add>, %67, %cst_29 [1] : vector<16x32xf32> to vector<16xf32>
    %69 = vector.shape_cast %68 : vector<16xf32> to vector<16x1xf32>
    %cst_30 = arith.constant 3.200000e+01 : f32
    %70 = vector.broadcast %cst_30 : f32 to vector<16x1xf32>
    %71 = arith.divf %69, %70 : vector<16x1xf32>
    %72 = vector.broadcast %64 : vector<16x1xf32> to vector<16x32xf32>
    %73 = arith.subf %60, %72 : vector<16x32xf32>
    %cst_31 = arith.constant 9.99999974E-6 : f32
    %74 = vector.broadcast %cst_31 : f32 to vector<16x1xf32>
    %75 = arith.addf %71, %74 : vector<16x1xf32>
    %76 = math.rsqrt %75 : vector<16x1xf32>
    %77 = vector.broadcast %76 : vector<16x1xf32> to vector<16x32xf32>
    %78 = arith.mulf %73, %77 : vector<16x32xf32>
    %c2 = arith.constant 2 : index
    %c0_32 = arith.constant 0 : index
    %79 = vector.load %arg2[%c2, %c0_32] : memref<8x128xf32, #tpu.memory_space<vmem>>, vector<1x32xf32>
    %80 = vector.broadcast %79 : vector<1x32xf32> to vector<16x32xf32>
    %81 = arith.mulf %78, %80 : vector<16x32xf32>
    %c3 = arith.constant 3 : index
    %c0_33 = arith.constant 0 : index
    %82 = vector.load %arg2[%c3, %c0_33] : memref<8x128xf32, #tpu.memory_space<vmem>>, vector<1x32xf32>
    %83 = vector.broadcast %82 : vector<1x32xf32> to vector<16x32xf32>
    %84 = arith.addf %81, %83 : vector<16x32xf32>
    %c0_34 = arith.constant 0 : index
    %c0_35 = arith.constant 0 : index
    %85 = vector.load %arg6[%c0_34, %c0_35] : memref<32x128xf32, #tpu.memory_space<vmem>>, vector<32x128xf32>
    %cst_36 = arith.constant dense<0.000000e+00> : vector<16x128xf32>
    %86 = tpu.matmul %84, %85, %cst_36 {dimension_numbers = #tpu.dot_dimension_numbers<[1], [0], [0], [1], [0, 0, 1, 1], [], []>} : vector<16x32xf32>, vector<32x128xf32>, vector<16x128xf32> -> vector<16x128xf32>
    %c5 = arith.constant 5 : index
    %c0_37 = arith.constant 0 : index
    %87 = vector.load %arg2[%c5, %c0_37] : memref<8x128xf32, #tpu.memory_space<vmem>>, vector<1x128xf32>
    %88 = vector.broadcast %87 : vector<1x128xf32> to vector<16x128xf32>
    %89 = arith.addf %86, %88 : vector<16x128xf32>
    %cst_38 = arith.constant 5.000000e-01 : f32
    %90 = vector.broadcast %cst_38 : f32 to vector<16x128xf32>
    %91 = arith.mulf %90, %89 : vector<16x128xf32>
    %cst_39 = arith.constant 1.41421354 : f32
    %92 = vector.broadcast %cst_39 : f32 to vector<16x128xf32>
    %93 = arith.divf %89, %92 : vector<16x128xf32>
    %94 = math.erf %93 : vector<16x128xf32>
    %cst_40 = arith.constant 1.000000e+00 : f32
    %95 = vector.broadcast %cst_40 : f32 to vector<16x128xf32>
    %96 = arith.addf %95, %94 : vector<16x128xf32>
    %97 = arith.mulf %91, %96 : vector<16x128xf32>
    %c0_41 = arith.constant 0 : index
    %c0_42 = arith.constant 0 : index
    %98 = vector.load %arg7[%c0_41, %c0_42] : memref<128x32xf32, #tpu.memory_space<vmem>>, vector<128x32xf32>
    %cst_43 = arith.constant dense<0.000000e+00> : vector<16x32xf32>
    %99 = tpu.matmul %97, %98, %cst_43 {dimension_numbers = #tpu.dot_dimension_numbers<[1], [0], [0], [1], [0, 0, 1, 1], [], []>} : vector<16x128xf32>, vector<128x32xf32>, vector<16x32xf32> -> vector<16x32xf32>
    %c6 = arith.constant 6 : index
    %c0_44 = arith.constant 0 : index
    %100 = vector.load %arg2[%c6, %c0_44] : memref<8x128xf32, #tpu.memory_space<vmem>>, vector<1x32xf32>
    %101 = vector.broadcast %100 : vector<1x32xf32> to vector<16x32xf32>
    %102 = arith.addf %99, %101 : vector<16x32xf32>
    %103 = arith.addf %102, %60 : vector<16x32xf32>
    %104 = vector.shape_cast %103 : vector<16x32xf32> to vector<2x8x32xf32>
    %c0_45 = arith.constant 0 : index
    %c0_46 = arith.constant 0 : index
    %c0_47 = arith.constant 0 : index
    %105 = vector.load %arg8[%c0_45, %c0_46, %c0_47] : memref<2x8x32xf32, #tpu.memory_space<vmem>>, vector<2x8x32xf32>
    tpu.vector_store %arg8[%c0_45, %c0_46, %c0_47], %104 {strides = array<i32>} : memref<2x8x32xf32, #tpu.memory_space<vmem>>, vector<2x8x32xf32>,
    return
  }
  func.func @transform_0(%arg0: i32) -> (i32, i32, i32) {
    %c0_i32 = arith.constant 0 : i32
    %c0_i32_0 = arith.constant 0 : i32
    %c0_i32_1 = arith.constant 0 : i32
    return %arg0, %c0_i32, %c0_i32_0 : i32, i32, i32
  }
  func.func @transform_1(%arg0: i32) -> (i32, i32) {
    %c0_i32 = arith.constant 0 : i32
    %c0_i32_0 = arith.constant 0 : i32
    %c0_i32_1 = arith.constant 0 : i32
    return %c0_i32, %c0_i32_0 : i32, i32
  }
  func.func @transform_2(%arg0: i32) -> (i32, i32, i32) {
    %c0_i32 = arith.constant 0 : i32
    %c0_i32_0 = arith.constant 0 : i32
    %c0_i32_1 = arith.constant 0 : i32
    %c0_i32_2 = arith.constant 0 : i32
    return %c0_i32, %c0_i32_0, %c0_i32_1 : i32, i32, i32
  }
  func.func @transform_3(%arg0: i32) -> (i32, i32, i32) {
    %c0_i32 = arith.constant 0 : i32
    %c0_i32_0 = arith.constant 0 : i32
    %c0_i32_1 = arith.constant 0 : i32
    %c0_i32_2 = arith.constant 0 : i32
    return %c0_i32, %c0_i32_0, %c0_i32_1 : i32, i32, i32
  }
  func.func @transform_4(%arg0: i32) -> (i32, i32, i32) {
    %c0_i32 = arith.constant 0 : i32
    %c0_i32_0 = arith.constant 0 : i32
    %c0_i32_1 = arith.constant 0 : i32
    %c0_i32_2 = arith.constant 0 : i32
    return %c0_i32, %c0_i32_0, %c0_i32_1 : i32, i32, i32
  }
  func.func @transform_5(%arg0: i32) -> (i32, i32) {
    %c0_i32 = arith.constant 0 : i32
    %c0_i32_0 = arith.constant 0 : i32
    %c0_i32_1 = arith.constant 0 : i32
    return %c0_i32, %c0_i32_0 : i32, i32
  }
  func.func @transform_6(%arg0: i32) -> (i32, i32) {
    %c0_i32 = arith.constant 0 : i32
    %c0_i32_0 = arith.constant 0 : i32
    %c0_i32_1 = arith.constant 0 : i32
    return %c0_i32, %c0_i32_0 : i32, i32
  }
  func.func @transform_7(%arg0: i32) -> (i32, i32, i32) {
    %c0_i32 = arith.constant 0 : i32
    %c0_i32_0 = arith.constant 0 : i32
    %c0_i32_1 = arith.constant 0 : i32
    return %arg0, %c0_i32, %c0_i32_0 : i32, i32, i32
  }
}

</mosaic_0001>

<bundles_post_ra>
// kernel: tpu_custom_call.1
= control target key start
LH: loop header
LB: loop body
LE: loop exit
PB: predicated region body
PF: predicated region fallthrough
CT: control target
= control target key end

     0   :  { %vm29_vm0 = vcmask 261120   ;;  %s1938_s0 = inlined_call_operand.vmem [shape: f32[2,8,32], index: 0, kind: input, shape index: {}]   ;;  %s1939_s1 = inlined_call_operand.vmem [shape: f32[8,128], index: 1, kind: input, shape index: {}]   ;;  %s1940_s2 = inlined_call_operand.vmem [shape: f32[8,32,24], index: 2, kind: input, shape index: {}]   ;;  %s1941_s3 = inlined_call_operand.vmem [shape: f32[8,1,24], index: 3, kind: input, shape index: {}]   ;;  %s1942_s4 = inlined_call_operand.vmem [shape: f32[8,8,32], index: 4, kind: input, shape index: {}]   ;;  %s1943_s5 = inlined_call_operand.vmem [shape: f32[32,128], index: 5, kind: input, shape index: {}]   ;;  %s1944_s6 = inlined_call_operand.vmem [shape: f32[128,32], index: 6, kind: input, shape index: {}]   ;;  %s1945_s7 = inlined_call_operand.hbm [shape: f32[2,8,32], index: 7, kind: output, shape index: {}]  }
   0x1   :  { %v1507_v0 = vld [vmem:[%s1938_s0] sm:$0xff]  ;;  %v1514_v2 = vld [vmem:[%s1938_s0 + $0x8] sm:$0xff] }
   0x2   :  { %v30_v1 = vsel %vm29_vm0, %v1507_v0, 0.0 }
   0x3   :  { %31 = vadd.xlane.f32.xlu0 %v30_v1 }
   0x4   :  { %12 = vsyncpa [#allocation3], 0  ;;  %v33_v3 = vsel %vm29_vm0, %v1514_v2, 0.0  ;;  %v1457_v4 = vmov 32.0   ;;  %v92_v21 = vld [vmem:[%s1940_s2 + $0x18] sm:$0xff]  ;;  %v91_v24 = vld [vmem:[%s1940_s2 + $0x10] sm:$0xff] }
   0x5   :  { %1383 = vrcp.f32 %v1457_v4  ;;  %v96_v22 = vld [vmem:[%s1940_s2 + $0x38] sm:$0xff]  ;;  %168 = vmatpush.msra.mxu0 %v92_v21  ;;  %v95_v25 = vld [vmem:[%s1940_s2 + $0x30] sm:$0xff]  ;;  %v90_v27 = vld [vmem:[%s1940_s2 + $0x8] sm:$0xff]  ;;  %vm322_vm8 = vcmask 64512   ;;  %s1461_s25 = smov [#allocation2]   ;;  %s1285_s0 = sshll.u32 %s1945_s7, 4  ;;  %s1286_s0 = int_to_ptr.hbm [resolvable:$true] %s1285_s0 }
   0x6   :  { %v104_v23 = vld [vmem:[%s1940_s2 + $0x78] sm:$0xff]  ;;  %188 = vmatpush.msra.mxu2 %v96_v22  ;;  %v103_v26 = vld [vmem:[%s1940_s2 + $0x70] sm:$0xff]  ;;  %v94_v28 = vld [vmem:[%s1940_s2 + $0x28] sm:$0xff]  ;;  %s1283_s26 = sshll.u32 %s1461_s25, 4  ;;  %s1463_s28 = smov 8   ;;  %s1284_s26 = int_to_ptr.vmem [resolvable:$true] %s1283_s26 }
   0x7   :  { %228 = vmatpush.msra.mxu3 %v104_v23  ;;  %169 = vmatpush.msra.mxu0 %v91_v24  ;;  %v102_v29 = vld [vmem:[%s1940_s2 + $0x68] sm:$0xff]  ;;  %v89_v30 = vld [vmem:[%s1940_s2] sm:$0xff]  ;;  %v100_v33 = vld [vmem:[%s1940_s2 + $0x58] sm:$0xff] }
   0x8   :  { %189 = vmatpush.msra.mxu2 %v95_v25  ;;  %v93_v31 = vld [vmem:[%s1940_s2 + $0x20] sm:$0xff]  ;;  %v108_v34 = vld [vmem:[%s1940_s2 + $0x98] sm:$0xff]  ;;  %v99_v36 = vld [vmem:[%s1940_s2 + $0x50] sm:$0xff] }
   0x9   :  { %229 = vmatpush.msra.mxu3 %v103_v26  ;;  %170 = vmatpush.msra.mxu0 %v90_v27  ;;  %v101_v32 = vld [vmem:[%s1940_s2 + $0x60] sm:$0xff]  ;;  %v112_v35 = vld [vmem:[%s1940_s2 + $0xb8] sm:$0xff]  ;;  %v107_v37 = vld [vmem:[%s1940_s2 + $0x90] sm:$0xff] }
   0xa   :  { %190 = vmatpush.msra.mxu2 %v94_v28  ;;  %v111_v38 = vld [vmem:[%s1940_s2 + $0xb0] sm:$0xff]  ;;  %v98_v40 = vld [vmem:[%s1940_s2 + $0x48] sm:$0xff]  ;;  %v97_v44 = vld [vmem:[%s1940_s2 + $0x40] sm:$0xff] }
   0xb   :  { %34 = vadd.xlane.f32.xlu0 %v33_v3  ;;  %v1384_v5 = vpop.eup %1383  ;;  %230 = vmatpush.msra.mxu3 %v102_v29  ;;  %v106_v41 = vld [vmem:[%s1940_s2 + $0x88] sm:$0xff]  ;;  %v105_v45 = vld [vmem:[%s1940_s2 + $0x80] sm:$0xff] }
   0xc   :  { %v37_v6 = vmul.f32 32.0, %v1384_v5  ;;  %vm41_vm1 = vweird.f32 %v1384_v5  ;;  %171 = vmatpush.msra.mxu0 %v89_v30  ;;  %191 = vmatpush.msra.mxu2 %v93_v31  ;;  %v110_v43 = vld [vmem:[%s1940_s2 + $0xa8] sm:$0xff]  ;;  %v109_v47 = vld [vmem:[%s1940_s2 + $0xa0] sm:$0xff] }
   0xd   :  { %231 = vmatpush.msra.mxu3 %v101_v32  ;;  %v1368_v59 = vld [vmem:[%s1939_s1] ss:$0 sm:$0xff]  ;;  %v1369_v63 = vld [vmem:[%s1939_s1 + $0x1] ss:$0 sm:$0xff]  ;;  %v1372_v21 = vld [vmem:[%s1941_s3 + $0x3] ss:$0 sm:$0xff] }
   0xe   :  { %v38_v7 = vsub.f32 1.0, %v37_v6  ;;  %208 = vmatpush.msrb.mxu2 %v100_v33  ;;  %251 = vmatpush.msrb.mxu0 %v108_v34  ;;  %v116_v6 = vld [vmem:[%s1940_s2 + $0xd8] sm:$0xff]  ;;  %v1374_v26 = vld [vmem:[%s1941_s3 + $0x2] ss:$0 sm:$0xff]  ;;  %v1375_v27 = vld [vmem:[%s1941_s3 + $0x5] ss:$0 sm:$0xff] }
   0xf   :  { %271 = vmatpush.msrb.mxu3 %v112_v35  ;;  %v1376_v32 = vld [vmem:[%s1941_s3 + $0x6] ss:$0 sm:$0xff]  ;;  %v1377_v33 = vld [vmem:[%s1941_s3 + $0x7] ss:$0 sm:$0xff] }
  0x10   :  { %v39_v8 = vmul.f32 %v1384_v5, %v38_v7  ;;  %209 = vmatpush.msrb.mxu2 %v99_v36  ;;  %252 = vmatpush.msrb.mxu0 %v107_v37 }
  0x11   :  { %272 = vmatpush.msrb.mxu3 %v111_v38 }
  0x12   :  { %v40_v9 = vadd.f32 %v1384_v5, %v39_v8  ;;  %210 = vmatpush.msrb.mxu2 %v98_v40  ;;  %253 = vmatpush.msrb.mxu0 %v106_v41  ;;  %v120_v8 = vld [vmem:[%s1940_s2 + $0xf8] sm:$0xff]  ;;  %v1373_v41 = vld [vmem:[%s1941_s3 + $0x4] ss:$0 sm:$0xff] }
  0x13   :  { %273 = vmatpush.msrb.mxu3 %v110_v43 }
  0x14   :  { %v1518_v10 = vsel %vm41_vm1, %v1384_v5, %v40_v9  ;;  %211 = vmatpush.msrb.mxu2 %v97_v44  ;;  %254 = vmatpush.msrb.mxu0 %v105_v45  ;;  %v115_v9 = vld [vmem:[%s1940_s2 + $0xd0] sm:$0xff] }
  0x15   :  { %274 = vmatpush.msrb.mxu3 %v109_v47 }
  0x76   :  { %v32_v11 = vpop.xlane.xlu0 %31 }
  0x77   :  { %v43_v12 = vmul.f32 %v1518_v10, %v32_v11 }
  0x79   :  { %v1522_v13 = vsub.f32 %v1507_v0, %v43_v12  ;;  %v119_v12 = vld [vmem:[%s1940_s2 + $0xf0] sm:$0xff] }
  0x7b   :  { %v47_v14 = vmul.f32 %v1522_v13, %v1522_v13 }
  0x7d   :  { %v49_v15 = vsel %vm29_vm0, %v47_v14, 0.0  ;;  %v114_v14 = vld [vmem:[%s1940_s2 + $0xc8] sm:$0xff] }
  0x7e   :  { %50 = vadd.xlane.f32.xlu1 %v49_v15  ;;  %v35_v16 = vpop.xlane.xlu0 %34  ;;  %v118_v15 = vld [vmem:[%s1940_s2 + $0xe8] sm:$0xff] }
  0x7f   :  { %v44_v17 = vmul.f32 %v1518_v10, %v35_v16 }
  0x81   :  { %v1529_v18 = vsub.f32 %v1514_v2, %v44_v17  ;;  %v113_v17 = vld [vmem:[%s1940_s2 + $0xc0] sm:$0xff] }
  0x83   :  { %v48_v19 = vmul.f32 %v1529_v18, %v1529_v18 }
  0x85   :  { %v52_v20 = vsel %vm29_vm0, %v48_v19, 0.0 }
  0x86   :  { %53 = vadd.xlane.f32.xlu1 %v52_v20  ;;  %v1371_v20 = vld [vmem:[%s1941_s3 + $0x1] ss:$0 sm:$0xff] }
  0xf1   :  { %v51_v39 = vpop.xlane.xlu1 %50 }
  0xf2   :  { %v55_v42 = vmul.f32 %v51_v39, %v1518_v10  ;;  %v1370_v39 = vld [vmem:[%s1941_s3] ss:$0 sm:$0xff]  ;;  %s1459_s3 = smov 112  }
  0xf4   :  { %v57_v46 = vadd.f32 1e-05, %v55_v42 }
  0xf6   :  { %1385 = vrsqrt.f32 %v57_v46  ;;  %vm65_vm3 = vweird.f32 %v57_v46 }
  0xf9   :  { %v54_v48 = vpop.xlane.xlu1 %53 }
  0xfa   :  { %v56_v49 = vmul.f32 %v54_v48, %v1518_v10 }
  0xfc   :  { %v1386_v50 = vpop.eup %1385  ;;  %v58_v51 = vadd.f32 1e-05, %v56_v49 }
  0xfd   :  { %v60_v52 = vmul.f32 %v1386_v50, %v57_v46  ;;  %vm66_vm2 = vweird.f32 %v1386_v50 }
  0xfe   :  { %1387 = vrsqrt.f32 %v58_v51  ;;  %vm67_vm4 = vmor %vm65_vm3, %vm66_vm2  ;;  %vm75_vm5 = vweird.f32 %v58_v51 }
  0xff   :  { %v61_v53 = vmul.f32 %v1386_v50, %v60_v52 }
 0x101   :  { %v62_v54 = vmul.f32 0.5, %v61_v53 }
 0x103   :  { %v63_v55 = vsub.f32 1.5, %v62_v54 }
 0x104   :  { %v1388_v56 = vpop.eup %1387 }
 0x105   :  { %v64_v57 = vmul.f32 %v1386_v50, %v63_v55  ;;  %v70_v58 = vmul.f32 %v1388_v56, %v58_v51  ;;  %vm76_vm6 = vweird.f32 %v1388_v56 }
 0x106   :  { %vm77_vm7 = vmor %vm75_vm5, %vm76_vm6 }
 0x107   :  { %v68_v60 = vsel %vm67_vm4, %v1386_v50, %v64_v57  ;;  %v71_v61 = vmul.f32 %v1388_v56, %v70_v58 }
 0x108   :  { %v79_v62 = vmul.f32 %v68_v60, %v1522_v13 }
 0x109   :  { %v72_v1 = vmul.f32 0.5, %v71_v61 }
 0x10a   :  { %v83_v3 = vmul.f32 %v1368_v59, %v79_v62 }
 0x10b   :  { %v73_v4 = vsub.f32 1.5, %v72_v1 }
 0x10c   :  { %v87_v5 = vadd.f32 %v1369_v63, %v83_v3 }
 0x10d   :  { %v74_v7 = vmul.f32 %v1388_v56, %v73_v4 }
 0x10e   :  { %1297 = vmatmul.msk.f32.vlgmr.msra.gmra.mxu0 %vm29_vm0, %v87_v5  ;;  %1298 = vmatmul.msk.f32.vlgmr.msra.gmra.mxu2 %vm29_vm0, %v87_v5 }
 0x10f   :  { %v78_v11 = vsel %vm77_vm7, %v1388_v56, %v74_v7  ;;  %1300 = vmatmul.msk.f32.vlgmr.msra.gmra.mxu3 %vm29_vm0, %v87_v5  ;;  %291 = vmatpush.msra.mxu2 %v116_v6 }
 0x110   :  { %v80_v13 = vmul.f32 %v78_v11, %v1529_v18  ;;  %311 = vmatpush.msra.mxu3 %v120_v8  ;;  %v117_v18 = vld [vmem:[%s1940_s2 + $0xe0] sm:$0xff]  ;;  %s1458_s2 = smov 120  }
 0x111   :  { %292 = vmatpush.msra.mxu2 %v115_v9 }
 0x112   :  { %v84_v16 = vmul.f32 %v1368_v59, %v80_v13  ;;  %312 = vmatpush.msra.mxu3 %v119_v12 }
 0x113   :  { %293 = vmatpush.msra.mxu2 %v114_v14 }
 0x114   :  { %v88_v19 = vadd.f32 %v1369_v63, %v84_v16  ;;  %313 = vmatpush.msra.mxu3 %v118_v15 }
 0x115   :  { %294 = vmatpush.msra.mxu2 %v113_v17 }
 0x116   :  { %1299 = vmatmul.msk.f32.vlgmr.msrb.gmra.mxu2 %vm29_vm0, %v87_v5  ;;  %1301 = vmatmul.msk.f32.vlgmr.msrb.gmra.mxu0 %vm29_vm0, %v88_v19 }
 0x117   :  { %1302 = vmatmul.msk.f32.vlgmr.msrb.gmra.mxu3 %vm29_vm0, %v88_v19 }
 0x118   :  { %314 = vmatpush.msra.mxu3 %v117_v18 }
 0x11e   :  { %1303 = vmatmul.msk.f32.vlgmr.msra.gmra.mxu2 %vm29_vm0, %v88_v19 }
 0x11f   :  { %1304 = vmatmul.msk.f32.vlgmr.msra.gmra.mxu3 %vm29_vm0, %v88_v19 }
 0x18b   :  { %v173_v38 = vpop.f32.mrf.mxu0 }
 0x18c   :  { %v1687_v40 = vadd.f32 %v1370_v39, %v173_v38 }
 0x191   :  { %v193_v22 = vpop.f32.mrf.mxu2 }
 0x192   :  { %v1654_v23 = vadd.f32 %v1371_v20, %v193_v22  ;;  %v233_v24 = vpop.f32.mrf.mxu3 }
 0x193   :  { %v1656_v25 = vadd.f32 %v1372_v21, %v233_v24  ;;  %v256_v42 = vpop.f32.mrf.mxu0 }
 0x194   :  { %348 = vrot.lane.b32.xlu2 %v1654_v23, %s1458_s2  ;;  %v1693_v43 = vadd.f32 %v1373_v41, %v256_v42 }
 0x195   :  { %402 = vrot.lane.b32.xlu0 %v1656_v25, %s1458_s2 }
 0x199   :  { %v213_v28 = vpop.f32.mrf.mxu2 }
 0x19a   :  { %v1666_v29 = vadd.f32 %v1374_v26, %v213_v28  ;;  %v276_v30 = vpop.f32.mrf.mxu3 }
 0x19b   :  { %v1668_v31 = vadd.f32 %v1375_v27, %v276_v30 }
 0x19c   :  { %375 = vrot.lane.b32.xlu2 %v1666_v29, %s1458_s2 }
 0x19d   :  { %456 = vrot.lane.b32.xlu0 %v1668_v31, %s1458_s2 }
 0x1a1   :  { %v296_v34 = vpop.f32.mrf.mxu2 }
 0x1a2   :  { %v1678_v35 = vadd.f32 %v1376_v32, %v296_v34  ;;  %v316_v36 = vpop.f32.mrf.mxu3 }
 0x1a3   :  { %v1680_v37 = vadd.f32 %v1377_v33, %v316_v36 }
 0x1a4   :  { %483 = vrot.lane.b32.xlu1 %v1678_v35, %s1458_s2 }
 0x1a5   :  { %510 = vrot.lane.b32.xlu2 %v1680_v37, %s1458_s2 }
 0x1ad   :  { %320 = vrot.lane.b32.xlu2 %v1687_v40, %s1458_s2 }
 0x1b5   :  { %429 = vrot.lane.b32.xlu2 %v1693_v43, %s1458_s2 }
 0x1ee   :  { %v349_v44 = vpop.permute.xlu2 %348 }
 0x1ef   :  { %1307 = vmatpush.xpose.msk.msrb.mxu2 %vm322_vm8, %v349_v44 }
 0x1f2   :  { %1308 = vmatmul.msk.f32.vlgmr.msrb.gmra.mxu2 %vm322_vm8, %v1654_v23 }
 0x1f6   :  { %v376_v45 = vpop.permute.xlu2 %375 }
 0x1f7   :  { %1309 = vmatpush.xpose.msk.msra.mxu2 %vm322_vm8, %v376_v45 }
 0x1fa   :  { %1310 = vmatmul.msk.f32.vlgmr.msra.gmra.mxu2 %vm322_vm8, %v1666_v29 }
 0x1ff   :  { %v511_v46 = vpop.permute.xlu2 %510 }
 0x207   :  { %v321_v47 = vpop.permute.xlu2 %320  ;;  %v403_v48 = vpop.permute.xlu0 %402 }
 0x208   :  { %1305 = vmatpush.xpose.msk.msra.mxu0 %vm322_vm8, %v321_v47  ;;  %1311 = vmatpush.xpose.msk.msrb.mxu3 %vm322_vm8, %v403_v48 }
 0x20b   :  { %1306 = vmatmul.msk.f32.vlgmr.msra.gmra.mxu0 %vm322_vm8, %v1687_v40  ;;  %1312 = vmatmul.msk.f32.vlgmr.msrb.gmra.mxu3 %vm322_vm8, %v1656_v25 }
 0x20c   :  { %1319 = vmatpush.xpose.msk.msra.mxu3 %vm322_vm8, %v511_v46 }
 0x20f   :  { %v430_v49 = vpop.permute.xlu2 %429  ;;  %v457_v50 = vpop.permute.xlu0 %456 }
 0x210   :  { %1313 = vmatpush.xpose.msk.msrb.mxu0 %vm322_vm8, %v430_v49  ;;  %1315 = vmatpush.xpose.msk.msra.mxu1 %vm322_vm8, %v457_v50 }
 0x213   :  { %1314 = vmatmul.msk.f32.vlgmr.msrb.gmra.mxu0 %vm322_vm8, %v1693_v43  ;;  %1316 = vmatmul.msk.f32.vlgmr.msra.gmra.mxu1 %vm322_vm8, %v1668_v31 }
 0x214   :  { %1320 = vmatmul.msk.f32.vlgmr.msra.gmra.mxu3 %vm322_vm8, %v1680_v37 }
 0x216   :  { %v484_v51 = vpop.permute.xlu1 %483 }
 0x217   :  { %1317 = vmatpush.xpose.msk.msrb.mxu2 %vm322_vm8, %v484_v51 }
 0x21a   :  { %1318 = vmatmul.msk.f32.vlgmr.msrb.gmra.mxu2 %vm322_vm8, %v1678_v35 }
 0x275   :  { %v371_v54 = vpop.f32.mrf.mxu2 }
 0x276   :  { %v537_v63 = vmul.f32 0.35355338, %v371_v54  ;;  %v1348_v54 = vpack.i.bf16 %v1656_v25, %v1666_v29 }
 0x278   :  { %v547_v3 = vsel %vm322_vm8, %v537_v63, -inf }
 0x27d   :  { %v398_v62 = vpop.f32.mrf.mxu2 }
 0x27e   :  { %v538_v1 = vmul.f32 0.35355338, %v398_v62 }
 0x280   :  { %v550_v5 = vsel %vm322_vm8, %v538_v1, -inf }
 0x288   :  { %v344_v52 = vpop.f32.mrf.mxu0 }
 0x289   :  { %v536_v53 = vmul.f32 0.35355338, %v344_v52 }
 0x28b   :  { %v544_v55 = vsel %vm322_vm8, %v536_v53, -inf }
 0x28c   :  { %545 = vmax.xlane.f32.xlu2 %v544_v55  ;;  %v1353_v55 = vpack.i.bf16 %v1687_v40, %v1678_v35 }
 0x28e   :  { %v425_v56 = vpop.f32.mrf.mxu3 }
 0x28f   :  { %v539_v57 = vmul.f32 0.35355338, %v425_v56  ;;  %v1358_v56 = vpack.i.bf16 %v1680_v37, %v1654_v23  ;;  %v1363_v23 = vpack.i.bf16 %v1668_v31, %v1693_v43 }
 0x290   :  { %v452_v58 = vpop.f32.mrf.mxu0  ;;  %v479_v4 = vpop.f32.mrf.mxu1 }
 0x291   :  { %v540_v59 = vmul.f32 0.35355338, %v452_v58  ;;  %v553_v60 = vsel %vm322_vm8, %v539_v57, -inf  ;;  %v1725_v6 = vmul.f32 0.35355338, %v479_v4 }
 0x292   :  { %554 = vmax.xlane.f32.xlu1 %v553_v60 }
 0x293   :  { %v556_v61 = vsel %vm322_vm8, %v540_v59, -inf  ;;  %v559_v12 = vsel %vm322_vm8, %v1725_v6, -inf }
 0x294   :  { %557 = vmax.xlane.f32.xlu2 %v556_v61 }
 0x297   :  { %v533_v11 = vpop.f32.mrf.mxu3 }
 0x298   :  { %v543_v13 = vmul.f32 0.35355338, %v533_v11 }
 0x29a   :  { %548 = vmax.xlane.f32.xlu1 %v547_v3  ;;  %v565_v14 = vsel %vm322_vm8, %v543_v13, -inf }
 0x29c   :  { %551 = vmax.xlane.f32.xlu2 %v550_v5 }
 0x29d   :  { %v506_v7 = vpop.f32.mrf.mxu2 }
 0x29e   :  { %v1727_v8 = vmul.f32 0.35355338, %v506_v7 }
 0x2a0   :  { %v562_v9 = vsel %vm322_vm8, %v1727_v8, -inf }
 0x2a1   :  { %563 = vmax.xlane.f32.xlu0 %v562_v9 }
 0x2a2   :  { %560 = vmax.xlane.f32.xlu1 %v559_v12 }
 0x2a9   :  { %566 = vmax.xlane.f32.xlu0 %v565_v14 }
 0x2ff   :  { %v546_v15 = vpop.xlane.xlu2 %545 }
 0x300   :  { %v568_v18 = vsub.f32 %v536_v53, %v546_v15 }
 0x302   :  { %v576_v21 = vmul.f32 1.442695, %v568_v18 }
 0x305   :  { %v555_v16 = vpop.xlane.xlu1 %554 }
 0x306   :  { %v571_v17 = vsub.f32 %v539_v57, %v555_v16 }
 0x307   :  { %v558_v19 = vpop.xlane.xlu2 %557 }
 0x308   :  { %v582_v20 = vmul.f32 1.442695, %v571_v17  ;;  %v572_v28 = vsub.f32 %v540_v59, %v558_v19 }
 0x30a   :  { %1389 = vpow2.f32 %v582_v20  ;;  %v584_v36 = vmul.f32 1.442695, %v572_v28 }
 0x30b   :  { %1391 = vpow2.f32 %v576_v21 }
 0x30d   :  { %v549_v22 = vpop.xlane.xlu1 %548 }
 0x30e   :  { %v569_v24 = vsub.f32 %v537_v63, %v549_v22 }
 0x30f   :  { %v552_v26 = vpop.xlane.xlu2 %551 }
 0x310   :  { %v1734_v27 = vpop.eup %1389  ;;  %v578_v30 = vmul.f32 1.442695, %v569_v24  ;;  %v570_v32 = vsub.f32 %v538_v1, %v552_v26 }
 0x311   :  { %v601_v33 = vsel %vm322_vm8, %v1734_v27, 0.0  ;;  %v1738_v39 = vpop.eup %1391 }
 0x312   :  { %1393 = vpow2.f32 %v578_v30  ;;  %v580_v34 = vmul.f32 1.442695, %v570_v32  ;;  %602 = vadd.xlane.f32.xlu2 %v601_v33  ;;  %v592_v42 = vsel %vm322_vm8, %v1738_v39, 0.0 }
 0x314   :  { %1395 = vpow2.f32 %v580_v34  ;;  %v564_v38 = vpop.xlane.xlu0 %563 }
 0x315   :  { %1397 = vpow2.f32 %v584_v36  ;;  %v561_v57 = vpop.xlane.xlu1 %560  ;;  %v574_v59 = vsub.f32 %v1727_v8, %v564_v38 }
 0x316   :  { %v573_v58 = vsub.f32 %v1725_v6, %v561_v57 }
 0x317   :  { %v588_v61 = vmul.f32 1.442695, %v574_v59 }
 0x318   :  { %v1740_v41 = vpop.eup %1393  ;;  %v586_v60 = vmul.f32 1.442695, %v573_v58 }
 0x319   :  { %v595_v44 = vsel %vm322_vm8, %v1740_v41, 0.0 }
 0x31a   :  { %v1396_v45 = vpop.eup %1395  ;;  %593 = vadd.xlane.f32.xlu2 %v592_v42  ;;  %596 = vadd.xlane.f32.xlu1 %v595_v44  ;;  %v841_v42 = vld [vmem:[%s1942_s4 + $0x8] sm:$0xff]  ;;  %v842_v44 = vld [vmem:[%s1942_s4 + $0x10] sm:$0xff] }
 0x31b   :  { %v598_v46 = vsel %vm322_vm8, %v1396_v45, 0.0  ;;  %v1747_v49 = vpop.eup %1397 }
 0x31c   :  { %599 = vadd.xlane.f32.xlu0 %v598_v46  ;;  %v567_v47 = vpop.xlane.xlu0 %566  ;;  %v604_v51 = vsel %vm322_vm8, %v1747_v49, 0.0  ;;  %v847_v46 = vld [vmem:[%s1942_s4 + $0x38] sm:$0xff] }
 0x31d   :  { %v575_v48 = vsub.f32 %v543_v13, %v567_v47 }
 0x31f   :  { %v590_v50 = vmul.f32 1.442695, %v575_v48 }
 0x321   :  { %1399 = vpow2.f32 %v590_v50 }
 0x322   :  { %605 = vadd.xlane.f32.xlu2 %v604_v51  ;;  %1401 = vpow2.f32 %v586_v60 }
 0x323   :  { %1403 = vpow2.f32 %v588_v61 }
 0x327   :  { %v1751_v52 = vpop.eup %1399 }
 0x328   :  { %v613_v53 = vsel %vm322_vm8, %v1751_v52, 0.0  ;;  %v1763_v25 = vpop.eup %1401 }
 0x329   :  { %v1404_v29 = vpop.eup %1403  ;;  %v607_v35 = vsel %vm322_vm8, %v1763_v25, 0.0 }
 0x32a   :  { %614 = vadd.xlane.f32.xlu2 %v613_v53  ;;  %v610_v40 = vsel %vm322_vm8, %v1404_v29, 0.0  ;;  %v844_v53 = vld [vmem:[%s1942_s4 + $0x20] sm:$0xff] }
 0x330   :  { %1349 = vrot.lane.b32.xlu0 %v1348_v54, %s1459_s3  ;;  %v845_v54 = vld [vmem:[%s1942_s4 + $0x28] sm:$0xff] }
 0x333   :  { %1354 = vrot.lane.b32.xlu1 %v1353_v55, %s1459_s3 }
 0x342   :  { %1359 = vrot.lane.b32.xlu2 %v1358_v56, %s1459_s3 }
 0x35a   :  { %608 = vadd.xlane.f32.xlu0 %v607_v35 }
 0x35d   :  { %611 = vadd.xlane.f32.xlu1 %v610_v40 }
 0x376   :  { %1364 = vrot.lane.b32.xlu1 %v1363_v23, %s1459_s3 }
 0x385   :  { %v603_v37 = vpop.xlane.xlu2 %602 }
 0x386   :  { %1405 = vrcp.f32 %v603_v37  ;;  %v1378_v37 = vld [vmem:[%s1939_s1 + $0x4] ss:$0 sm:$0xff] }
 0x38c   :  { %v1406_v5 = vpop.eup %1405 }
 0x38d   :  { %v594_v62 = vpop.xlane.xlu2 %593  ;;  %v597_v3 = vpop.xlane.xlu1 %596  ;;  %v627_v31 = vmul.f32 %v1406_v5, %v1734_v27 }
 0x38f   :  { %v600_v1 = vpop.xlane.xlu0 %599 }
 0x390   :  { %1407 = vrcp.f32 %v600_v1 }
 0x391   :  { %1409 = vrcp.f32 %v594_v62 }
 0x392   :  { %1411 = vrcp.f32 %v597_v3 }
 0x395   :  { %v606_v63 = vpop.xlane.xlu2 %605 }
 0x396   :  { %v1408_v6 = vpop.eup %1407 }
 0x397   :  { %v1410_v11 = vpop.eup %1409  ;;  %v626_v43 = vmul.f32 %v1408_v6, %v1396_v45  ;;  %v843_v45 = vld [vmem:[%s1942_s4 + $0x18] sm:$0xff] }
 0x398   :  { %v1412_v12 = vpop.eup %1411  ;;  %v624_v18 = vmul.f32 %v1410_v11, %v1738_v39 }
 0x399   :  { %v625_v20 = vmul.f32 %v1412_v12, %v1740_v41  ;;  %v840_v41 = vld [vmem:[%s1942_s4] sm:$0xff] }
 0x39d   :  { %v615_v4 = vpop.xlane.xlu2 %614 }
 0x39e   :  { %1413 = vrcp.f32 %v615_v4 }
 0x3a2   :  { %v1350_v7 = vpop.permute.xlu0 %1349 }
 0x3a3   :  { %v1352_v8 = vunpack.i.h.bf16 %v1350_v7  ;;  %v1351_v9 = vunpack.i.l.bf16 %v1350_v7 }
 0x3a4   :  { %v1414_v21 = vpop.eup %1413 }
 0x3a5   :  { %v1355_v13 = vpop.permute.xlu1 %1354  ;;  %v1360_v14 = vpop.permute.xlu2 %1359  ;;  %705 = vmatpush.msra.mxu2 %v1351_v9  ;;  %731 = vmatpush.msrb.mxu3 %v1352_v8  ;;  %v631_v22 = vmul.f32 %v1414_v21, %v1751_v52  ;;  %v846_v52 = vld [vmem:[%s1942_s4 + $0x30] sm:$0xff] }
 0x3a6   :  { %v1357_v15 = vunpack.i.h.bf16 %v1355_v13  ;;  %v1356_v16 = vunpack.i.l.bf16 %v1355_v13  ;;  %v1362_v17 = vunpack.i.h.bf16 %v1360_v14  ;;  %1323 = vmatmul.msk.f32.vlgmr.msra.gmra.mxu2 %vm322_vm8, %v626_v43  ;;  %1324 = vmatmul.msk.f32.vlgmr.msrb.gmra.mxu3 %vm322_vm8, %v627_v31  ;;  %v1361_v19 = vunpack.i.l.bf16 %v1360_v14 }
 0x3a8   :  { %653 = vmatpush.msra.mxu0 %v1357_v15  ;;  %679 = vmatpush.msrb.mxu1 %v1361_v19 }
 0x3a9   :  { %809 = vmatpush.msrb.mxu2 %v1356_v16  ;;  %835 = vmatpush.msra.mxu3 %v1362_v17 }
 0x3aa   :  { %1321 = vmatmul.msk.f32.vlgmr.msra.gmra.mxu0 %vm322_vm8, %v624_v18  ;;  %1322 = vmatmul.msk.f32.vlgmr.msrb.gmra.mxu1 %vm322_vm8, %v625_v20 }
 0x3ab   :  { %912 = vmatpush.msra.mxu2 %v842_v44  ;;  %935 = vmatpush.msrb.mxu3 %v843_v45 }
 0x3ae   :  { %1328 = vmatmul.msk.f32.vlgmr.msra.gmra.mxu3 %vm322_vm8, %v631_v22 }
 0x3af   :  { %1027 = vmatpush.msra.mxu3 %v847_v46 }
 0x3cd   :  { %v609_v28 = vpop.xlane.xlu0 %608 }
 0x3d0   :  { %v612_v24 = vpop.xlane.xlu1 %611 }
 0x3d1   :  { %1415 = vrcp.f32 %v612_v24 }
 0x3d2   :  { %1417 = vrcp.f32 %v606_v63 }
 0x3d3   :  { %1419 = vrcp.f32 %v609_v28  ;;  %v1107_v28 = vld [vmem:[%s1943_s5 + $0x18] sm:$0xff] }
 0x3d7   :  { %v1416_v26 = vpop.eup %1415 }
 0x3d8   :  { %v630_v27 = vmul.f32 %v1416_v26, %v1404_v29  ;;  %v1418_v30 = vpop.eup %1417 }
 0x3d9   :  { %v1420_v32 = vpop.eup %1419  ;;  %v628_v38 = vmul.f32 %v1418_v30, %v1747_v49  ;;  %v1106_v30 = vld [vmem:[%s1943_s5 + $0x10] sm:$0xff] }
 0x3da   :  { %1327 = vmatmul.msk.f32.vlgmr.msrb.gmra.mxu2 %vm322_vm8, %v630_v27  ;;  %v629_v39 = vmul.f32 %v1420_v32, %v1763_v25  ;;  %v1105_v32 = vld [vmem:[%s1943_s5 + $0x8] sm:$0xff] }
 0x3db   :  { %1004 = vmatpush.msrb.mxu2 %v846_v52 }
 0x3e8   :  { %v1365_v33 = vpop.permute.xlu1 %1364 }
 0x3e9   :  { %v1367_v34 = vunpack.i.h.bf16 %v1365_v33  ;;  %v1366_v36 = vunpack.i.l.bf16 %v1365_v33  ;;  %v1104_v33 = vld [vmem:[%s1943_s5] sm:$0xff] }
 0x3eb   :  { %757 = vmatpush.msrb.mxu0 %v1366_v36  ;;  %783 = vmatpush.msra.mxu1 %v1367_v34 }
 0x3ec   :  { %1325 = vmatmul.msk.f32.vlgmr.msrb.gmra.mxu0 %vm322_vm8, %v628_v38  ;;  %1326 = vmatmul.msk.f32.vlgmr.msra.gmra.mxu1 %vm322_vm8, %v629_v39 }
 0x3ed   :  { %866 = vmatpush.msra.mxu0 %v840_v41  ;;  %889 = vmatpush.msrb.mxu1 %v841_v42 }
 0x3ef   :  { %958 = vmatpush.msrb.mxu0 %v844_v53  ;;  %981 = vmatpush.msra.mxu1 %v845_v54 }
 0x427   :  { %v655_v47 = vpop.f32.mrf.mxu0  ;;  %v681_v48 = vpop.f32.mrf.mxu1 }
 0x428   :  { %1329 = vmatmul.msk.f32.vlgmr.msra.gmra.mxu0 %vm322_vm8, %v655_v47  ;;  %1330 = vmatmul.msk.f32.vlgmr.msrb.gmra.mxu1 %vm322_vm8, %v681_v48  ;;  %v1379_v47 = vld [vmem:[%s1939_s1 + $0x2] ss:$0 sm:$0xff] }
 0x429   :  { %v707_v49 = vpop.f32.mrf.mxu2  ;;  %v733_v50 = vpop.f32.mrf.mxu3  ;;  %1128 = vmatpush.msra.mxu0 %v1107_v28  ;;  %v1238_v28 = vld [vmem:[%s1944_s6 + $0x20] sm:$0xff] }
 0x42a   :  { %1331 = vmatmul.msk.f32.vlgmr.msra.gmra.mxu2 %vm322_vm8, %v707_v49  ;;  %1332 = vmatmul.msk.f32.vlgmr.msrb.gmra.mxu3 %vm322_vm8, %v733_v50  ;;  %v1380_v50 = vld [vmem:[%s1939_s1 + $0x3] ss:$0 sm:$0xff] }
 0x42b   :  { %1129 = vmatpush.msra.mxu0 %v1106_v30 }
 0x42d   :  { %1130 = vmatpush.msra.mxu0 %v1105_v32  ;;  %v1237_v32 = vld [vmem:[%s1944_s6 + $0x18] sm:$0xff] }
 0x42f   :  { %1131 = vmatpush.msra.mxu0 %v1104_v33 }
 0x431   :  { %v837_v51 = vpop.f32.mrf.mxu3 }
 0x432   :  { %1336 = vmatmul.msk.f32.vlgmr.msra.gmra.mxu3 %vm322_vm8, %v837_v51 }
 0x45d   :  { %v811_v55 = vpop.f32.mrf.mxu2 }
 0x45e   :  { %1335 = vmatmul.msk.f32.vlgmr.msrb.gmra.mxu2 %vm322_vm8, %v811_v55 }
 0x469   :  { %v759_v56 = vpop.f32.mrf.mxu0  ;;  %v785_v57 = vpop.f32.mrf.mxu1 }
 0x46a   :  { %1333 = vmatmul.msk.f32.vlgmr.msrb.gmra.mxu0 %vm322_vm8, %v759_v56  ;;  %1334 = vmatmul.msk.f32.vlgmr.msra.gmra.mxu1 %vm322_vm8, %v785_v57 }
 0x4a5   :  { %v868_v58 = vpop.f32.mrf.mxu0  ;;  %v891_v59 = vpop.f32.mrf.mxu1 }
 0x4a6   :  { %v1032_v60 = vsel %vm29_vm0, %v868_v58, 0.0  ;;  %v1033_v61 = vsel %vm29_vm0, %v891_v59, 0.0 }
 0x4a7   :  { %v1034_v25 = vadd.f32 %v1033_v61, %v1032_v60 }
 0x4ad   :  { %v914_v29 = vpop.f32.mrf.mxu2  ;;  %v937_v35 = vpop.f32.mrf.mxu3 }
 0x4ae   :  { %v1035_v40 = vsel %vm29_vm0, %v914_v29, 0.0  ;;  %v1037_v62 = vsel %vm29_vm0, %v937_v35, 0.0 }
 0x4af   :  { %v1036_v23 = vadd.f32 %v1035_v40, %v1034_v25 }
 0x4b1   :  { %v1038_v63 = vadd.f32 %v1037_v62, %v1036_v23  ;;  %v1460_v23 = vmov 1.4142135  }
 0x4b3   :  { %v1048_v1 = vadd.f32 %v1378_v37, %v1038_v63  ;;  %v1249_v63 = vld [vmem:[%s1944_s6 + $0x78] sm:$0xff] }
 0x4b4   :  { %1252 = vmatpush.msrb.mxu1 %v1249_v63 }
 0x4b5   :  { %v1824_v3 = vadd.f32 %v1048_v1, %v1507_v0  ;;  %v1029_v11 = vpop.f32.mrf.mxu3 }
 0x4b6   :  { %v1044_v13 = vsel %vm29_vm0, %v1029_v11, 0.0 }
 0x4b7   :  { %v1052_v4 = vsel %vm29_vm0, %v1824_v3, 0.0 }
 0x4b8   :  { %1053 = vadd.xlane.f32.xlu1 %v1052_v4  ;;  %v1248_v4 = vld [vmem:[%s1944_s6 + $0x70] sm:$0xff] }
 0x4b9   :  { %1253 = vmatpush.msrb.mxu1 %v1248_v4 }
 0x4e1   :  { %v1006_v5 = vpop.f32.mrf.mxu2 }
 0x4e2   :  { %v1042_v43 = vsel %vm29_vm0, %v1006_v5, 0.0  ;;  %v1247_v5 = vld [vmem:[%s1944_s6 + $0x68] sm:$0xff] }
 0x4e3   :  { %1254 = vmatpush.msrb.mxu1 %v1247_v5 }
 0x4e7   :  { %v960_v6 = vpop.f32.mrf.mxu0  ;;  %v983_v7 = vpop.f32.mrf.mxu1 }
 0x4e8   :  { %v1039_v8 = vsel %vm29_vm0, %v960_v6, 0.0  ;;  %v1040_v9 = vsel %vm29_vm0, %v983_v7, 0.0  ;;  %v1877_v7 = vld [vmem:[%s1939_s1 + $0x5] ss:$0 sm:$0xff] }
 0x4e9   :  { %v1041_v31 = vadd.f32 %v1040_v9, %v1039_v8  ;;  %v1246_v8 = vld [vmem:[%s1944_s6 + $0x60] sm:$0xff]  ;;  %v1245_v9 = vld [vmem:[%s1944_s6 + $0x58] sm:$0xff] }
 0x4ea   :  { %1255 = vmatpush.msrb.mxu1 %v1246_v8 }
 0x4eb   :  { %v1043_v12 = vadd.f32 %v1042_v43, %v1041_v31 }
 0x4ec   :  { %1256 = vmatpush.msrb.mxu1 %v1245_v9 }
 0x4ed   :  { %v1045_v0 = vadd.f32 %v1044_v13, %v1043_v12  ;;  %v1244_v12 = vld [vmem:[%s1944_s6 + $0x50] sm:$0xff] }
 0x4ee   :  { %1257 = vmatpush.msrb.mxu1 %v1244_v12 }
 0x4ef   :  { %v1049_v14 = vadd.f32 %v1378_v37, %v1045_v0  ;;  %v1243_v0 = vld [vmem:[%s1944_s6 + $0x48] sm:$0xff] }
 0x4f0   :  { %1258 = vmatpush.msrb.mxu1 %v1243_v0 }
 0x4f1   :  { %v1833_v15 = vadd.f32 %v1049_v14, %v1514_v2 }
 0x4f3   :  { %v1055_v16 = vsel %vm29_vm0, %v1833_v15, 0.0 }
 0x4f4   :  { %1056 = vadd.xlane.f32.xlu2 %v1055_v16  ;;  %v1242_v16 = vld [vmem:[%s1944_s6 + $0x40] sm:$0xff] }
 0x4f5   :  { %1259 = vmatpush.msrb.mxu1 %v1242_v16 }
 0x52b   :  { %v1054_v17 = vpop.xlane.xlu1 %1053 }
 0x52c   :  { %v1058_v19 = vmul.f32 %v1054_v17, %v1518_v10 }
 0x52e   :  { %v1060_v18 = vsub.f32 %v1824_v3, %v1058_v19  ;;  %v1241_v19 = vld [vmem:[%s1944_s6 + $0x38] sm:$0xff] }
 0x52f   :  { %1260 = vmatpush.msrb.mxu1 %v1241_v19 }
 0x530   :  { %v1062_v20 = vmul.f32 %v1060_v18, %v1060_v18 }
 0x532   :  { %v1064_v21 = vsel %vm29_vm0, %v1062_v20, 0.0 }
 0x533   :  { %1065 = vadd.xlane.f32.xlu0 %v1064_v21  ;;  %v1240_v21 = vld [vmem:[%s1944_s6 + $0x30] sm:$0xff] }
 0x534   :  { %1261 = vmatpush.msrb.mxu1 %v1240_v21 }
 0x567   :  { %v1057_v22 = vpop.xlane.xlu2 %1056 }
 0x568   :  { %v1059_v24 = vmul.f32 %v1057_v22, %v1518_v10 }
 0x56a   :  { %v1061_v26 = vsub.f32 %v1833_v15, %v1059_v24 }
 0x56c   :  { %v1063_v2 = vmul.f32 %v1061_v26, %v1061_v26 }
 0x56e   :  { %v1067_v27 = vsel %vm29_vm0, %v1063_v2, 0.0 }
 0x56f   :  { %1068 = vadd.xlane.f32.xlu0 %v1067_v27 }
 0x5a6   :  { %v1066_v34 = vpop.xlane.xlu0 %1065 }
 0x5a7   :  { %v1070_v36 = vmul.f32 %v1066_v34, %v1518_v10 }
 0x5a9   :  { %v1072_v38 = vadd.f32 1e-05, %v1070_v36  ;;  %v1236_v36 = vld [vmem:[%s1944_s6 + $0x10] sm:$0xff] }
 0x5ab   :  { %1421 = vrsqrt.f32 %v1072_v38  ;;  %vm1080_vm10 = vweird.f32 %v1072_v38 }
 0x5b1   :  { %v1422_v39 = vpop.eup %1421 }
 0x5b2   :  { %v1075_v41 = vmul.f32 %v1422_v39, %v1072_v38  ;;  %vm1081_vm9 = vweird.f32 %v1422_v39 }
 0x5b3   :  { %vm1082_vm11 = vmor %vm1080_vm10, %vm1081_vm9 }
 0x5b4   :  { %v1076_v42 = vmul.f32 %v1422_v39, %v1075_v41 }
 0x5b6   :  { %v1077_v44 = vmul.f32 0.5, %v1076_v42  ;;  %v1234_v42 = vld [vmem:[%s1944_s6] sm:$0xff] }
 0x5b8   :  { %v1078_v45 = vsub.f32 1.5, %v1077_v44 }
 0x5ba   :  { %v1079_v46 = vmul.f32 %v1422_v39, %v1078_v45 }
 0x5bc   :  { %v1083_v48 = vsel %vm1082_vm11, %v1422_v39, %v1079_v46  ;;  %v1235_v39 = vld [vmem:[%s1944_s6 + $0x8] sm:$0xff] }
 0x5bd   :  { %v1094_v49 = vmul.f32 %v1083_v48, %v1060_v18 }
 0x5bf   :  { %v1098_v51 = vmul.f32 %v1379_v47, %v1094_v49 }
 0x5c1   :  { %v1102_v52 = vadd.f32 %v1380_v50, %v1098_v51 }
 0x5c3   :  { %1337 = vmatmul.msk.f32.vlgmr.msra.gmra.mxu0 %vm29_vm0, %v1102_v52 }
 0x5e2   :  { %v1069_v53 = vpop.xlane.xlu0 %1068 }
 0x5e3   :  { %v1071_v54 = vmul.f32 %v1069_v53, %v1518_v10 }
 0x5e5   :  { %v1073_v55 = vadd.f32 1e-05, %v1071_v54 }
 0x5e7   :  { %1423 = vrsqrt.f32 %v1073_v55  ;;  %vm1090_vm13 = vweird.f32 %v1073_v55 }
 0x5e8   :  { %1425 = vrcp.f32 %v1460_v23 }
 0x5ed   :  { %v1424_v56 = vpop.eup %1423 }
 0x5ee   :  { %v1085_v57 = vmul.f32 %v1424_v56, %v1073_v55  ;;  %vm1091_vm12 = vweird.f32 %v1424_v56  ;;  %v1426_v10 = vpop.eup %1425 }
 0x5ef   :  { %vm1092_vm14 = vmor %vm1090_vm13, %vm1091_vm12  ;;  %v1142_v37 = vmul.f32 1.4142135, %v1426_v10  ;;  %vm1146_vm15 = vweird.f32 %v1426_v10 }
 0x5f0   :  { %v1086_v58 = vmul.f32 %v1424_v56, %v1085_v57 }
 0x5f1   :  { %v1143_v62 = vsub.f32 1.0, %v1142_v37 }
 0x5f2   :  { %v1087_v59 = vmul.f32 0.5, %v1086_v58 }
 0x5f3   :  { %v1144_v1 = vmul.f32 %v1426_v10, %v1143_v62 }
 0x5f4   :  { %v1088_v60 = vsub.f32 1.5, %v1087_v59 }
 0x5f5   :  { %v1145_v6 = vadd.f32 %v1426_v10, %v1144_v1 }
 0x5f6   :  { %v1089_v61 = vmul.f32 %v1424_v56, %v1088_v60 }
 0x5f7   :  { %v1885_v31 = vsel %vm1146_vm15, %v1426_v10, %v1145_v6 }
 0x5f8   :  { %v1093_v25 = vsel %vm1092_vm14, %v1424_v56, %v1089_v61 }
 0x5f9   :  { %v1095_v29 = vmul.f32 %v1093_v25, %v1061_v26  ;;  %v1239_v26 = vld [vmem:[%s1944_s6 + $0x28] sm:$0xff] }
 0x5fa   :  { %1262 = vmatpush.msrb.mxu1 %v1239_v26 }
 0x5fb   :  { %v1099_v35 = vmul.f32 %v1379_v47, %v1095_v29 }
 0x5fc   :  { %1263 = vmatpush.msrb.mxu1 %v1238_v28 }
 0x5fd   :  { %v1103_v40 = vadd.f32 %v1380_v50, %v1099_v35 }
 0x5fe   :  { %1264 = vmatpush.msrb.mxu1 %v1237_v32 }
 0x5ff   :  { %1338 = vmatmul.msk.f32.gmra.mxu0 %vm29_vm0, %v1103_v40 }
 0x600   :  { %1265 = vmatpush.msrb.mxu1 %v1236_v36 }
 0x602   :  { %1266 = vmatpush.msrb.mxu1 %v1235_v39 }
 0x604   :  { %1267 = vmatpush.msrb.mxu1 %v1234_v42 }
 0x640   :  { %v1133_v11 = vpop.f32.mrf.mxu0 }
 0x641   :  { %v1888_v43 = vadd.f32 %v1877_v7, %v1133_v11 }
 0x643   :  { %v1148_v13 = vmul.f32 %v1885_v31, %v1888_v43  ;;  %v1139_v23 = vmul.f32 0.5, %v1888_v43 }
 0x645   :  { %v1150_v14 = vmul.f32 %v1148_v13, %v1148_v13 }
 0x647   :  { %v1151_v17 = vmin.f32 %v1150_v14, 16.0 }
 0x649   :  { %v1152_v18 = vmul.f32 2.1237322e-06, %v1151_v17  ;;  %v1163_v20 = vmul.f32 3.8918573e-05, %v1151_v17 }
 0x64b   :  { %v1153_v22 = vadd.f32 0.00028619796, %v1152_v18  ;;  %v1164_v24 = vadd.f32 0.001143296, %v1163_v20 }
 0x64d   :  { %v1154_v2 = vmul.f32 %v1153_v22, %v1151_v17  ;;  %v1165_v27 = vmul.f32 %v1164_v24, %v1151_v17 }
 0x64f   :  { %v1166_v30 = vadd.f32 0.014752088, %v1165_v27  ;;  %v1155_v33 = vadd.f32 0.0036580483, %v1154_v2 }
 0x651   :  { %v1167_v34 = vmul.f32 %v1166_v30, %v1151_v17  ;;  %v1156_v41 = vmul.f32 %v1155_v33, %v1151_v17 }
 0x653   :  { %v1168_v38 = vadd.f32 0.112945676, %v1167_v34  ;;  %v1157_v46 = vadd.f32 0.05243302, %v1156_v41 }
 0x655   :  { %v1169_v44 = vmul.f32 %v1168_v38, %v1151_v17  ;;  %v1158_v49 = vmul.f32 %v1157_v46, %v1151_v17 }
 0x657   :  { %v1170_v45 = vadd.f32 0.4994258, %v1169_v44  ;;  %v1159_v50 = vadd.f32 0.18741608, %v1158_v49 }
 0x659   :  { %v1171_v47 = vmul.f32 %v1170_v45, %v1151_v17  ;;  %v1160_v52 = vmul.f32 %v1159_v50, %v1151_v17 }
 0x65b   :  { %v1172_v48 = vadd.f32 1.0, %v1171_v47  ;;  %v1161_v56 = vadd.f32 1.1283791, %v1160_v52 }
 0x65d   :  { %1427 = vrcp.f32 %v1172_v48  ;;  %v1184_v55 = vand.u32 2147483648, %v1172_v48  ;;  %v1182_v58 = vand.u32 2147483647, %v1172_v48  ;;  %vm1178_vm2 = vweird.f32 %v1172_v48 }
 0x65e   :  { %v1162_v61 = vmul.f32 %v1161_v56, %v1148_v13 }
 0x65f   :  { %v1185_v60 = vor.u32 1.1754944e-38, %v1184_v55  ;;  %vm1183_vm4 = vcmp.eq.f32.partialorder %v1182_v58, 8.507059e+37 }
 0x663   :  { %v1428_v51 = vpop.eup %1427 }
 0x664   :  { %v1174_v53 = vmul.f32 %v1428_v51, %v1172_v48  ;;  %vm1179_vm1 = vweird.f32 %v1428_v51  ;;  %v1382_v48 = vld [vmem:[%s1939_s1 + $0x6] ss:$0 sm:$0xff]  ;;  %s1462_s1 = smov 128  }
 0x665   :  { %vm1180_vm3 = vmor %vm1178_vm2, %vm1179_vm1 }
 0x666   :  { %v1175_v54 = vsub.f32 1.0, %v1174_v53 }
 0x668   :  { %v1176_v57 = vmul.f32 %v1428_v51, %v1175_v54 }
 0x66a   :  { %v1177_v59 = vadd.f32 %v1428_v51, %v1176_v57 }
 0x66c   :  { %v1181_v25 = vsel %vm1180_vm3, %v1428_v51, %v1177_v59 }
 0x66d   :  { %v1186_v29 = vsel %vm1183_vm4, %v1185_v60, %v1181_v25 }
 0x66e   :  { %v1187_v35 = vmul.f32 %v1186_v29, %v1162_v61 }
 0x670   :  { %v1339_v40 = vclamps-f32 %v1187_v35, 1.0 }
 0x672   :  { %v1230_v10 = vadd.f32 1.0, %v1339_v40 }
 0x674   :  { %v1232_v37 = vmul.f32 %v1230_v10, %v1139_v23 }
 0x676   :  { %1268 = vmatmul.f32.vlgmr.msrb.gmra.mxu1 %v1232_v37 }
 0x67c   :  { %v1136_v62 = vpop.f32.mrf.mxu0 }
 0x67d   :  { %v1137_v63 = vadd.f32 %v1877_v7, %v1136_v62 }
 0x67f   :  { %v1149_v1 = vmul.f32 %v1885_v31, %v1137_v63  ;;  %v1140_v45 = vmul.f32 0.5, %v1137_v63 }
 0x681   :  { %v1190_v4 = vmul.f32 %v1149_v1, %v1149_v1 }
 0x683   :  { %v1191_v5 = vmin.f32 %v1190_v4, 16.0 }
 0x685   :  { %v1192_v6 = vmul.f32 2.1237322e-06, %v1191_v5  ;;  %v1203_v8 = vmul.f32 3.8918573e-05, %v1191_v5 }
 0x687   :  { %v1193_v9 = vadd.f32 0.00028619796, %v1192_v6  ;;  %v1204_v11 = vadd.f32 0.001143296, %v1203_v8 }
 0x689   :  { %v1194_v12 = vmul.f32 %v1193_v9, %v1191_v5  ;;  %v1205_v13 = vmul.f32 %v1204_v11, %v1191_v5 }
 0x68b   :  { %v1206_v0 = vadd.f32 0.014752088, %v1205_v13  ;;  %v1195_v14 = vadd.f32 0.0036580483, %v1194_v12 }
 0x68d   :  { %v1207_v16 = vmul.f32 %v1206_v0, %v1191_v5  ;;  %v1196_v17 = vmul.f32 %v1195_v14, %v1191_v5 }
 0x68f   :  { %v1208_v43 = vadd.f32 0.112945676, %v1207_v16  ;;  %v1197_v20 = vadd.f32 0.05243302, %v1196_v17 }
 0x691   :  { %v1209_v19 = vmul.f32 %v1208_v43, %v1191_v5  ;;  %v1198_v22 = vmul.f32 %v1197_v20, %v1191_v5 }
 0x693   :  { %v1210_v18 = vadd.f32 0.4994258, %v1209_v19  ;;  %v1199_v31 = vadd.f32 0.18741608, %v1198_v22 }
 0x695   :  { %v1211_v21 = vmul.f32 %v1210_v18, %v1191_v5  ;;  %v1200_v26 = vmul.f32 %v1199_v31, %v1191_v5 }
 0x697   :  { %v1212_v7 = vadd.f32 1.0, %v1211_v21  ;;  %v1201_v30 = vadd.f32 1.1283791, %v1200_v26 }
 0x699   :  { %1429 = vrcp.f32 %v1212_v7  ;;  %v1224_v28 = vand.u32 2147483648, %v1212_v7  ;;  %v1222_v33 = vand.u32 2147483647, %v1212_v7  ;;  %vm1218_vm6 = vweird.f32 %v1212_v7 }
 0x69a   :  { %v1202_v38 = vmul.f32 %v1201_v30, %v1149_v1 }
 0x69b   :  { %v1225_v36 = vor.u32 1.1754944e-38, %v1224_v28  ;;  %vm1223_vm8 = vcmp.eq.f32.partialorder %v1222_v33, 8.507059e+37 }
 0x69f   :  { %v1430_v24 = vpop.eup %1429 }
 0x6a0   :  { %v1214_v2 = vmul.f32 %v1430_v24, %v1212_v7  ;;  %vm1219_vm5 = vweird.f32 %v1430_v24 }
 0x6a1   :  { %vm1220_vm7 = vmor %vm1218_vm6, %vm1219_vm5 }
 0x6a2   :  { %v1215_v27 = vsub.f32 1.0, %v1214_v2 }
 0x6a4   :  { %v1216_v32 = vmul.f32 %v1430_v24, %v1215_v27 }
 0x6a6   :  { %v1217_v34 = vadd.f32 %v1430_v24, %v1216_v32 }
 0x6a8   :  { %v1221_v39 = vsel %vm1220_vm7, %v1430_v24, %v1217_v34 }
 0x6a9   :  { %v1226_v41 = vsel %vm1223_vm8, %v1225_v36, %v1221_v39 }
 0x6aa   :  { %v1227_v42 = vmul.f32 %v1226_v41, %v1202_v38 }
 0x6ac   :  { %v1340_v44 = vclamps-f32 %v1227_v42, 1.0 }
 0x6ae   :  { %v1231_v46 = vadd.f32 1.0, %v1340_v44 }
 0x6b0   :  { %v1233_v47 = vmul.f32 %v1231_v46, %v1140_v45 }
 0x6b2   :  { %1271 = vmatmul.f32.gmra.mxu1 %v1233_v47 }
 0x6f3   :  { %v1269_v49 = vpop.f32.mrf.mxu1 }
 0x6f4   :  { %v1270_v50 = vadd.f32 %v1382_v48, %v1269_v49 }
 0x6f6   :  { %v1275_v51 = vadd.f32 %v1270_v50, %v1824_v3 }
 0x6f8   :  { %1277 = vst.msk [vmem:[#allocation2] sm:$0xff] %vm29_vm0, %v1275_v51 }
 0x72f   :  { %v1272_v52 = vpop.f32.mrf.mxu1 }
 0x730   :  { %v1273_v53 = vadd.f32 %v1382_v48, %v1272_v52 }
 0x732   :  { %v1276_v54 = vadd.f32 %v1273_v53, %v1833_v15 }
 0x734   :  { %1278 = vst.msk [vmem:[#allocation2 + $0x8] sm:$0xff] %vm29_vm0, %v1276_v54 }
 0x735   :  { %1291 = dma.vmem_to_hbm [thread:$0]  %s1284_s26, 256, %s1286_s0, [#allocation3], %s1462_s1, %s1462_s1, %s1463_s28  }
 0x736   :  { %1455 = dma.done.wait [#allocation3], 256  }
 0x737   :  { %1456 = vsyncadd [#allocation3], 4294967040 }
 0x738   :  { %1296 = vsyncpa [#allocation3], 1 }

</bundles_post_ra>
